<compile_context>
chip_gen: v5e
topology: v5e:2x2
jax: 0.10.0
libtpu: 0.0.40
codegen_flags: <defaults>
</compile_context>

<pallas_src>
import jax
import jax.numpy as jnp
from jax.experimental import pallas as pl
from jax.experimental.pallas import tpu as pltpu

constants = [0.1, 0.5, 1.0, 2.0, 5.0, 10.0, -0.1, -0.5, -1.0, -2.0]
features = ['Open', 'High', 'Low', 'Close', 'Volume']
operators = ['+', '-', '*', '/', 'log', 'exp', 'sqrt', 'abs', '**2']

ACTION_DIM = len(features) + len(constants) + len(operators)  # 24
STATE_DIM = 3
HIDDEN = 128
PAD_OUT = 128  # lane-dense width used only for in-VMEM compute of the last layer


def _round_up(n, m):
    return ((n + m - 1) // m) * m


def _choose_tile(B, tb_max=1024):
    """Pick (tb, Bp) with tb a multiple of 8, Bp % tb == 0, minimal padded rows,
    and >=2 grid steps for large batches (v7x megacore)."""
    Bp = _round_up(max(B, 8), 8)
    if Bp <= tb_max:
        # Single tile covers everything; split in two for megacore if it is big.
        if Bp >= 1024 and (Bp // 2) % 8 == 0:
            return Bp // 2, Bp
        return Bp, Bp
    best_tb, best_pad = 8, (-B) % 8
    for tb in range(tb_max, 7, -8):
        pad = (-B) % tb
        if pad < best_pad or (pad == best_pad and tb > best_tb):
            best_tb, best_pad = tb, pad
        if pad == 0:
            break
    return best_tb, B + best_pad


def policy_kernel(x_ref, w1_ref, b1_ref, w2_ref, b2_ref, w3_ref, b3_ref, o_ref):
    # x.float() in torch -> cast to f32 here.
    x = x_ref[...].astype(jnp.float32)              # (TB, 3)
    w1 = w1_ref[...]                                # (3, 128)

    # Linear(3, 128): K=3 matmul is pure MXU latency -> three VPU broadcast-FMAs.
    h1 = (x[:, 0:1] * w1[0:1, :]
          + x[:, 1:2] * w1[1:2, :]
          + x[:, 2:3] * w1[2:3, :]
          + b1_ref[...])
    h1 = jnp.maximum(h1, 0.0)

    # Linear(128, 128) + ReLU on the MXU (operand dtype follows the stored weight).
    w2 = w2_ref[...]
    h2 = jnp.dot(h1.astype(w2.dtype), w2,
                 preferred_element_type=jnp.float32) + b2_ref[...]
    h2 = jnp.maximum(h2, 0.0)

    # Linear(128, 128-padded): padded weight columns are zero and padded bias
    # entries are -1e30, so padded logits exp to 0 in the softmax (mask folded
    # into the bias -- no iota/where needed here).
    w3 = w3_ref[...]
    logits = jnp.dot(h2.astype(w3.dtype), w3,
                     preferred_element_type=jnp.float32) + b3_ref[...]

    # Numerically stable softmax over the 128 (lane-dense) columns.
    m = jnp.max(logits, axis=-1, keepdims=True)
    e = jnp.exp(logits - m)
    s = jnp.sum(e, axis=-1, keepdims=True)
    probs = e * pl.reciprocal(s, approx=False)      # exact divide; approx=True needs looser tests

    # Only the real action columns go back to HBM (masked in-VMEM store, cheap).
    o_ref[...] = probs[:, :ACTION_DIM]


def prepare_params(params, use_bf16=False):
    """One-time (per parameter set) padding / casting, hoisted out of the
    per-forward-call path."""
    w1, b1, w2, b2, w3, b3 = params
    w3_p = jnp.zeros((HIDDEN, PAD_OUT), jnp.float32).at[:, :ACTION_DIM].set(w3)
    # Fold the padded-lane softmax mask into the bias.
    b3_p = jnp.full((1, PAD_OUT), -1e30, jnp.float32).at[:, :ACTION_DIM].set(b3)
    if use_bf16:
        # bf16 MXU operands (~3-4x MXU throughput, half the weight DMA);
        # breaks 1e-5 allclose vs an f32 reference, so it is opt-in.
        w2 = w2.astype(jnp.bfloat16)
        w3_p = w3_p.astype(jnp.bfloat16)
    return (w1, b1, w2, b2, w3_p, b3_p)


def policy_forward(x, prepped_params, tb_max=1024):
    """x: (B, STATE_DIM). Returns softmax probabilities of shape (B, ACTION_DIM)."""
    w1, b1, w2, b2, w3_p, b3_p = prepped_params
    B = x.shape[0]

    tb, Bp = _choose_tile(B, tb_max)

    if Bp == B:
        x_p = x.astype(jnp.float32)
    else:
        x_p = jnp.zeros((Bp, STATE_DIM), jnp.float32).at[:B, :].set(
            x.astype(jnp.float32))

    resident = lambda arr: pl.BlockSpec(arr.shape, lambda i: (0,) * arr.ndim)

    out = pl.pallas_call(
        policy_kernel,
        out_shape=jax.ShapeDtypeStruct((Bp, ACTION_DIM), jnp.float32),
        grid=(Bp // tb,),
        in_specs=[
            pl.BlockSpec((tb, STATE_DIM), lambda i: (i, 0)),  # x: streamed per tile
            resident(w1), resident(b1),                       # weights: resident
            resident(w2), resident(b2),
            resident(w3_p), resident(b3_p),
        ],
        # Last block dim equals the full array dim (24), so this is legal and
        # the writeback is 24 f32/row instead of a 128-wide padded slab.
        out_specs=pl.BlockSpec((tb, ACTION_DIM), lambda i: (i, 0)),
        compiler_params=pltpu.CompilerParams(
            dimension_semantics=("parallel",)),               # megacore on v7x
    )(x_p, w1, b1, w2, b2, w3_p, b3_p)

    return out if Bp == B else out[:B]


def init_params(key):
    """Deterministic init mimicking torch's default Linear init:
    U(-1/sqrt(fan_in), 1/sqrt(fan_in)) for both weight and bias.
    Weights are stored (in_features, out_features) so the kernel does x @ W + b."""
    def linear(key, fan_in, fan_out):
        kw, kb = jax.random.split(key)
        bound = 1.0 / jnp.sqrt(float(fan_in))
        w = jax.random.uniform(kw, (fan_in, fan_out), jnp.float32, -bound, bound)
        b = jax.random.uniform(kb, (1, fan_out), jnp.float32, -bound, bound)
        return w, b

    k1, k2, k3 = jax.random.split(key, 3)
    w1, b1 = linear(k1, STATE_DIM, HIDDEN)
    w2, b2 = linear(k2, HIDDEN, HIDDEN)
    w3, b3 = linear(k3, HIDDEN, ACTION_DIM)
    return (w1, b1, w2, b2, w3, b3)


if __name__ == "__main__":
    key = jax.random.PRNGKey(0)
    kp, kx = jax.random.split(key)

    params = init_params(kp)
    prepped = prepare_params(params, use_bf16=False)  # padding hoisted out of the call path

    # Small example batch: (batch=8, state_dim=3)
    x = jax.random.normal(kx, (8, STATE_DIM), dtype=jnp.float32)

    out = policy_forward(x, prepped)
    out = jax.block_until_ready(out)

    # Sanity checks vs. pure-JAX reference.
    w1, b1, w2, b2, w3, b3 = params
    h1 = jnp.maximum(x @ w1 + b1, 0.0)
    h2 = jnp.maximum(h1 @ w2 + b2, 0.0)
    ref = jax.nn.softmax(h2 @ w3 + b3, axis=-1)

    assert out.shape == (8, ACTION_DIM)
    assert jnp.allclose(jnp.sum(out, axis=-1), 1.0, atol=1e-5)
    assert jnp.allclose(out, ref, atol=1e-5)

    print("KERNEL_OK")
</pallas_src>

<mosaic_0001>
module attributes {stable_mosaic.version = 11 : i64} {
  func.func @policy_kernel(%arg0: i32, %arg1: memref<8x3xf32, #tpu.memory_space<vmem>>, %arg2: memref<3x128xf32, #tpu.memory_space<vmem>>, %arg3: memref<1x128xf32, #tpu.memory_space<vmem>>, %arg4: memref<128x128xf32, #tpu.memory_space<vmem>>, %arg5: memref<1x128xf32, #tpu.memory_space<vmem>>, %arg6: memref<128x128xf32, #tpu.memory_space<vmem>>, %arg7: memref<1x128xf32, #tpu.memory_space<vmem>>, %arg8: memref<8x24xf32, #tpu.memory_space<vmem>>) attributes {dimension_semantics = [#tpu.dimension_semantics<parallel>], iteration_bounds = array<i64: 1>, scalar_prefetch = 0 : i64, scratch_operands = 0 : i64, tpu.core_type = #tpu.core_type<tc>, window_params = [{transform_indices = @transform_0, window_bounds = array<i64: 8, 3>}, {pipeline_mode = #tpu.pipeline_mode<synchronous>, transform_indices = @transform_1, window_bounds = array<i64: 3, 128>}, {pipeline_mode = #tpu.pipeline_mode<synchronous>, transform_indices = @transform_2, window_bounds = array<i64: 1, 128>}, {pipeline_mode = #tpu.pipeline_mode<synchronous>, transform_indices = @transform_3, window_bounds = array<i64: 128, 128>}, {pipeline_mode = #tpu.pipeline_mode<synchronous>, transform_indices = @transform_4, window_bounds = array<i64: 1, 128>}, {pipeline_mode = #tpu.pipeline_mode<synchronous>, transform_indices = @transform_5, window_bounds = array<i64: 128, 128>}, {pipeline_mode = #tpu.pipeline_mode<synchronous>, transform_indices = @transform_6, window_bounds = array<i64: 1, 128>}, {transform_indices = @transform_7, window_bounds = array<i64: 8, 24>}]} {
    %c0 = arith.constant 0 : index
    %c0_0 = arith.constant 0 : index
    %0 = vector.load %arg1[%c0, %c0_0] : memref<8x3xf32, #tpu.memory_space<vmem>>, vector<8x3xf32>
    %c0_1 = arith.constant 0 : index
    %c0_2 = arith.constant 0 : index
    %1 = vector.load %arg2[%c0_1, %c0_2] : memref<3x128xf32, #tpu.memory_space<vmem>>, vector<3x128xf32>
    %2 = vector.extract_strided_slice %0 {offsets = [0, 0], sizes = [8, 1], strides = [1, 1]} : vector<8x3xf32> to vector<8x1xf32>
    %3 = vector.extract_strided_slice %1 {offsets = [0, 0], sizes = [1, 128], strides = [1, 1]} : vector<3x128xf32> to vector<1x128xf32>
    %4 = vector.broadcast %2 : vector<8x1xf32> to vector<8x128xf32>
    %5 = vector.broadcast %3 : vector<1x128xf32> to vector<8x128xf32>
    %6 = arith.mulf %4, %5 : vector<8x128xf32>
    %7 = vector.extract_strided_slice %0 {offsets = [0, 1], sizes = [8, 1], strides = [1, 1]} : vector<8x3xf32> to vector<8x1xf32>
    %8 = vector.extract_strided_slice %1 {offsets = [1, 0], sizes = [1, 128], strides = [1, 1]} : vector<3x128xf32> to vector<1x128xf32>
    %9 = vector.broadcast %7 : vector<8x1xf32> to vector<8x128xf32>
    %10 = vector.broadcast %8 : vector<1x128xf32> to vector<8x128xf32>
    %11 = arith.mulf %9, %10 : vector<8x128xf32>
    %12 = arith.addf %6, %11 : vector<8x128xf32>
    %13 = vector.extract_strided_slice %0 {offsets = [0, 2], sizes = [8, 1], strides = [1, 1]} : vector<8x3xf32> to vector<8x1xf32>
    %14 = vector.extract_strided_slice %1 {offsets = [2, 0], sizes = [1, 128], strides = [1, 1]} : vector<3x128xf32> to vector<1x128xf32>
    %15 = vector.broadcast %13 : vector<8x1xf32> to vector<8x128xf32>
    %16 = vector.broadcast %14 : vector<1x128xf32> to vector<8x128xf32>
    %17 = arith.mulf %15, %16 : vector<8x128xf32>
    %18 = arith.addf %12, %17 : vector<8x128xf32>
    %c0_3 = arith.constant 0 : index
    %c0_4 = arith.constant 0 : index
    %19 = vector.load %arg3[%c0_3, %c0_4] : memref<1x128xf32, #tpu.memory_space<vmem>>, vector<1x128xf32>
    %20 = vector.broadcast %19 : vector<1x128xf32> to vector<8x128xf32>
    %21 = arith.addf %18, %20 : vector<8x128xf32>
    %cst = arith.constant 0.000000e+00 : f32
    %22 = vector.broadcast %cst : f32 to vector<8x128xf32>
    %23 = arith.maximumf %21, %22 : vector<8x128xf32>
    %c0_5 = arith.constant 0 : index
    %c0_6 = arith.constant 0 : index
    %24 = vector.load %arg4[%c0_5, %c0_6] : memref<128x128xf32, #tpu.memory_space<vmem>>, vector<128x128xf32>
    %cst_7 = arith.constant dense<0.000000e+00> : vector<8x128xf32>
    %25 = tpu.matmul %23, %24, %cst_7 {dimension_numbers = #tpu.dot_dimension_numbers<[1], [0], [0], [1], [0, 0, 1, 1], [], []>} : vector<8x128xf32>, vector<128x128xf32>, vector<8x128xf32> -> vector<8x128xf32>
    %c0_8 = arith.constant 0 : index
    %c0_9 = arith.constant 0 : index
    %26 = vector.load %arg5[%c0_8, %c0_9] : memref<1x128xf32, #tpu.memory_space<vmem>>, vector<1x128xf32>
    %27 = vector.broadcast %26 : vector<1x128xf32> to vector<8x128xf32>
    %28 = arith.addf %25, %27 : vector<8x128xf32>
    %cst_10 = arith.constant 0.000000e+00 : f32
    %29 = vector.broadcast %cst_10 : f32 to vector<8x128xf32>
    %30 = arith.maximumf %28, %29 : vector<8x128xf32>
    %c0_11 = arith.constant 0 : index
    %c0_12 = arith.constant 0 : index
    %31 = vector.load %arg6[%c0_11, %c0_12] : memref<128x128xf32, #tpu.memory_space<vmem>>, vector<128x128xf32>
    %cst_13 = arith.constant dense<0.000000e+00> : vector<8x128xf32>
    %32 = tpu.matmul %30, %31, %cst_13 {dimension_numbers = #tpu.dot_dimension_numbers<[1], [0], [0], [1], [0, 0, 1, 1], [], []>} : vector<8x128xf32>, vector<128x128xf32>, vector<8x128xf32> -> vector<8x128xf32>
    %c0_14 = arith.constant 0 : index
    %c0_15 = arith.constant 0 : index
    %33 = vector.load %arg7[%c0_14, %c0_15] : memref<1x128xf32, #tpu.memory_space<vmem>>, vector<1x128xf32>
    %34 = vector.broadcast %33 : vector<1x128xf32> to vector<8x128xf32>
    %35 = arith.addf %32, %34 : vector<8x128xf32>
    %cst_16 = arith.constant dense<0xFF800000> : vector<8xf32>
    %36 = vector.multi_reduction <maximumf>, %35, %cst_16 [1] : vector<8x128xf32> to vector<8xf32>
    %37 = vector.shape_cast %36 : vector<8xf32> to vector<8x1xf32>
    %38 = vector.broadcast %37 : vector<8x1xf32> to vector<8x128xf32>
    %39 = arith.subf %35, %38 : vector<8x128xf32>
    %40 = math.exp %39 : vector<8x128xf32>
    %cst_17 = arith.constant dense<0.000000e+00> : vector<8xf32>
    %41 = vector.multi_reduction <add>, %40, %cst_17 [1] : vector<8x128xf32> to vector<8xf32>
    %42 = vector.shape_cast %41 : vector<8xf32> to vector<8x1xf32>
    %43 = tpu.reciprocal %42 : vector<8x1xf32> -> vector<8x1xf32>
    %44 = vector.broadcast %43 : vector<8x1xf32> to vector<8x128xf32>
    %45 = arith.mulf %40, %44 : vector<8x128xf32>
    %46 = vector.extract_strided_slice %45 {offsets = [0, 0], sizes = [8, 24], strides = [1, 1]} : vector<8x128xf32> to vector<8x24xf32>
    %c0_18 = arith.constant 0 : index
    %c0_19 = arith.constant 0 : index
    %47 = vector.load %arg8[%c0_18, %c0_19] : memref<8x24xf32, #tpu.memory_space<vmem>>, vector<8x24xf32>
    tpu.vector_store %arg8[%c0_18, %c0_19], %46 {strides = array<i32>} : memref<8x24xf32, #tpu.memory_space<vmem>>, vector<8x24xf32>,
    return
  }
  func.func @transform_0(%arg0: i32) -> (i32, i32) {
    %c0_i32 = arith.constant 0 : i32
    %c0_i32_0 = arith.constant 0 : i32
    return %arg0, %c0_i32 : i32, i32
  }
  func.func @transform_1(%arg0: i32) -> (i32, i32) {
    %c0_i32 = arith.constant 0 : i32
    %c0_i32_0 = arith.constant 0 : i32
    %c0_i32_1 = arith.constant 0 : i32
    return %c0_i32, %c0_i32_0 : i32, i32
  }
  func.func @transform_2(%arg0: i32) -> (i32, i32) {
    %c0_i32 = arith.constant 0 : i32
    %c0_i32_0 = arith.constant 0 : i32
    %c0_i32_1 = arith.constant 0 : i32
    return %c0_i32, %c0_i32_0 : i32, i32
  }
  func.func @transform_3(%arg0: i32) -> (i32, i32) {
    %c0_i32 = arith.constant 0 : i32
    %c0_i32_0 = arith.constant 0 : i32
    %c0_i32_1 = arith.constant 0 : i32
    return %c0_i32, %c0_i32_0 : i32, i32
  }
  func.func @transform_4(%arg0: i32) -> (i32, i32) {
    %c0_i32 = arith.constant 0 : i32
    %c0_i32_0 = arith.constant 0 : i32
    %c0_i32_1 = arith.constant 0 : i32
    return %c0_i32, %c0_i32_0 : i32, i32
  }
  func.func @transform_5(%arg0: i32) -> (i32, i32) {
    %c0_i32 = arith.constant 0 : i32
    %c0_i32_0 = arith.constant 0 : i32
    %c0_i32_1 = arith.constant 0 : i32
    return %c0_i32, %c0_i32_0 : i32, i32
  }
  func.func @transform_6(%arg0: i32) -> (i32, i32) {
    %c0_i32 = arith.constant 0 : i32
    %c0_i32_0 = arith.constant 0 : i32
    %c0_i32_1 = arith.constant 0 : i32
    return %c0_i32, %c0_i32_0 : i32, i32
  }
  func.func @transform_7(%arg0: i32) -> (i32, i32) {
    %c0_i32 = arith.constant 0 : i32
    %c0_i32_0 = arith.constant 0 : i32
    return %arg0, %c0_i32 : i32, i32
  }
}

</mosaic_0001>

<bundles_post_ra>
// kernel: tpu_custom_call.1
= control target key start
LH: loop header
LB: loop body
LE: loop exit
PB: predicated region body
PF: predicated region fallthrough
CT: control target
= control target key end

     0   :  { %12 = vsyncpa [#allocation3], 0  ;;  %s380_s0 = inlined_call_operand.vmem [shape: f32[8,3], index: 0, kind: input, shape index: {}]   ;;  %s381_s1 = inlined_call_operand.vmem [shape: f32[3,128], index: 1, kind: input, shape index: {}]   ;;  %s382_s2 = inlined_call_operand.vmem [shape: f32[1,128], index: 2, kind: input, shape index: {}]   ;;  %s383_s3 = inlined_call_operand.hbm [shape: f32[128,128], index: 3, kind: input, shape index: {}]   ;;  %s384_s4 = inlined_call_operand.vmem [shape: f32[1,128], index: 4, kind: input, shape index: {}]   ;;  %s385_s5 = inlined_call_operand.hbm [shape: f32[128,128], index: 5, kind: input, shape index: {}]   ;;  %s386_s6 = inlined_call_operand.vmem [shape: f32[1,128], index: 6, kind: input, shape index: {}]   ;;  %s387_s7 = inlined_call_operand.hbm [shape: f32[8,24], index: 7, kind: output, shape index: {}]  }
   0x1   :  { %13 = vsyncpa [#allocation6], 0 }
   0x2   :  { %14 = vsyncpa [#allocation4], 0  ;;  %s25_s26 = sshll.u32 %s383_s3, 4  ;;  %s308_s27 = smov [#allocation2]   ;;  %s26_s26 = int_to_ptr.hbm [resolvable:$true] %s25_s26 }
   0x3   :  { %s27_s28 = sshll.u32 %s308_s27, 4  ;;  %s40_s8 = sshll.u32 %s385_s5, 4  ;;  %s28_s28 = int_to_ptr.vmem [resolvable:$true] %s27_s28  ;;  %s41_s8 = int_to_ptr.hbm [resolvable:$true] %s40_s8 }
   0x4   :  { %s309_s9 = smov 128   ;;  %s310_s10 = smov 8  }
   0x5   :  { %33 = dma.hbm_to_vmem [thread:$0]  %s26_s26, 2048, %s28_s28, [#allocation3], %s309_s9, %s309_s9, %s310_s10  }
   0x6   :  { %s311_s11 = smov [#allocation5]  }
   0x7   :  { %s42_s12 = sshll.u32 %s311_s11, 4  ;;  %s43_s12 = int_to_ptr.vmem [resolvable:$true] %s42_s12 }
   0x8   :  { %48 = dma.hbm_to_vmem [thread:$0]  %s41_s8, 2048, %s43_s12, [#allocation6], %s309_s9, %s309_s9, %s310_s10  }
   0x9   :  { %302 = dma.done.wait [#allocation3], 2048  }
   0xa   :  { %303 = vsyncadd [#allocation3], 4294965248 }
   0xb   :  { %304 = dma.done.wait [#allocation6], 2048  }
   0xc   :  { %305 = vsyncadd [#allocation6], 4294965248  ;;  %v312_v0 = vmov 0   ;;  %v313_v1 = vmov 2   ;;  %v59_v2 = vld [vmem:[%s380_s0] sm:$0xff]  ;;  %v103_v3 = vld [vmem:[#allocation2 + $0x78] sm:$0xff] }
   0xd   :  { %219 = vset.pattern.permute.xlu0 %v312_v0  ;;  %221 = vset.pattern.permute.xlu1 %v313_v1  ;;  %v102_v4 = vld [vmem:[#allocation2 + $0x70] sm:$0xff]  ;;  %v101_v5 = vld [vmem:[#allocation2 + $0x68] sm:$0xff]  ;;  %v100_v6 = vld [vmem:[#allocation2 + $0x60] sm:$0xff]  ;;  %v314_v8 = vmov 1   ;;  %s200_s20 = sshll.u32 %s387_s7, 4  ;;  %vm191_vm4 = vcmask 195584   ;;  %s201_s20 = int_to_ptr.hbm [resolvable:$true] %s200_s20 }
   0xe   :  { %63 = vperm.xlu0 %219, %v59_v2   ;;  %76 = vperm.xlu1 %221, %v59_v2   ;;  %v99_v7 = vld [vmem:[#allocation2 + $0x58] sm:$0xff]  ;;  %v98_v9 = vld [vmem:[#allocation2 + $0x50] sm:$0xff]  ;;  %v97_v10 = vld [vmem:[#allocation2 + $0x48] sm:$0xff] }
   0xf   :  { %108 = vmatpush.msra.mxu0 %v103_v3  ;;  %v96_v11 = vld [vmem:[#allocation2 + $0x40] sm:$0xff]  ;;  %v95_v12 = vld [vmem:[#allocation2 + $0x38] sm:$0xff]  ;;  %v94_v13 = vld [vmem:[#allocation2 + $0x30] sm:$0xff] }
  0x10   :  { %v93_v14 = vld [vmem:[#allocation2 + $0x28] sm:$0xff]  ;;  %v92_v15 = vld [vmem:[#allocation2 + $0x20] sm:$0xff]  ;;  %v91_v16 = vld [vmem:[#allocation2 + $0x18] sm:$0xff] }
  0x11   :  { %109 = vmatpush.msra.mxu0 %v102_v4  ;;  %v90_v17 = vld [vmem:[#allocation2 + $0x10] sm:$0xff]  ;;  %v89_v18 = vld [vmem:[#allocation2 + $0x8] sm:$0xff]  ;;  %v88_v19 = vld [vmem:[#allocation2] sm:$0xff] }
  0x12   :  { %v144_v20 = vld [vmem:[#allocation5 + $0x78] sm:$0xff]  ;;  %v143_v21 = vld [vmem:[#allocation5 + $0x70] sm:$0xff]  ;;  %v142_v22 = vld [vmem:[#allocation5 + $0x68] sm:$0xff] }
  0x13   :  { %110 = vmatpush.msra.mxu0 %v101_v5  ;;  %149 = vmatpush.msra.mxu1 %v144_v20  ;;  %v141_v23 = vld [vmem:[#allocation5 + $0x60] sm:$0xff]  ;;  %v140_v24 = vld [vmem:[#allocation5 + $0x58] sm:$0xff]  ;;  %v139_v25 = vld [vmem:[#allocation5 + $0x50] sm:$0xff] }
  0x14   :  { %v138_v26 = vld [vmem:[#allocation5 + $0x48] sm:$0xff]  ;;  %v137_v28 = vld [vmem:[#allocation5 + $0x40] sm:$0xff]  ;;  %v136_v29 = vld [vmem:[#allocation5 + $0x38] sm:$0xff] }
  0x15   :  { %111 = vmatpush.msra.mxu0 %v100_v6  ;;  %150 = vmatpush.msra.mxu1 %v143_v21  ;;  %v60_v30 = vld [vmem:[%s381_s1] sm:$0x7]  ;;  %v135_v31 = vld [vmem:[#allocation5 + $0x30] sm:$0xff]  ;;  %v134_v35 = vld [vmem:[#allocation5 + $0x28] sm:$0xff] }
  0x16   :  { %220 = vset.pattern.permute.xlu0 %v314_v8  ;;  %v66_v32 = vperm.slane %v60_v30, 0  ;;  %v72_v33 = vperm.slane %v60_v30, 1  ;;  %v79_v34 = vperm.slane %v60_v30, 2  ;;  %v133_v37 = vld [vmem:[#allocation5 + $0x20] sm:$0xff]  ;;  %v132_v42 = vld [vmem:[#allocation5 + $0x18] sm:$0xff]  ;;  %v131_v48 = vld [vmem:[#allocation5 + $0x10] sm:$0xff] }
  0x17   :  { %69 = vperm.xlu0 %220, %v59_v2   ;;  %112 = vmatpush.msra.mxu0 %v99_v7  ;;  %v223_v44 = vld [vmem:[%s382_s2] ss:$0 sm:$0xff]  ;;  %v130_v49 = vld [vmem:[#allocation5 + $0x8] sm:$0xff] }
  0x18   :  { %151 = vmatpush.msra.mxu1 %v142_v22  ;;  %v129_v50 = vld [vmem:[#allocation5] sm:$0xff] }
  0x19   :  { %113 = vmatpush.msra.mxu0 %v98_v9  ;;  %v224_v51 = vld [vmem:[%s384_s4] ss:$0 sm:$0xff]  ;;  %s315_s4 = smov [#allocation7]  }
  0x1a   :  { %152 = vmatpush.msra.mxu1 %v141_v23  ;;  %v225_v55 = vld [vmem:[%s386_s6] ss:$0 sm:$0xff]  ;;  %s198_s6 = sshll.u32 %s315_s4, 4  ;;  %s199_s6 = int_to_ptr.vmem [resolvable:$true] %s198_s6 }
  0x1b   :  { %114 = vmatpush.msra.mxu0 %v97_v10 }
  0x1c   :  { %153 = vmatpush.msra.mxu1 %v140_v24 }
  0x1d   :  { %115 = vmatpush.msra.mxu0 %v96_v11 }
  0x1e   :  { %154 = vmatpush.msra.mxu1 %v139_v25 }
  0x1f   :  { %222 = vset.pattern.permute.xlu0 %v313_v1  ;;  %116 = vmatpush.msra.mxu0 %v95_v12 }
  0x20   :  { %155 = vmatpush.msra.mxu1 %v138_v26 }
  0x21   :  { %117 = vmatpush.msra.mxu0 %v94_v13 }
  0x22   :  { %156 = vmatpush.msra.mxu1 %v137_v28 }
  0x23   :  { %118 = vmatpush.msra.mxu0 %v93_v14 }
  0x24   :  { %157 = vmatpush.msra.mxu1 %v136_v29 }
  0x25   :  { %119 = vmatpush.msra.mxu0 %v92_v15 }
  0x26   :  { %158 = vmatpush.msra.mxu1 %v135_v31 }
  0x27   :  { %120 = vmatpush.msra.mxu0 %v91_v16 }
  0x28   :  { %159 = vmatpush.msra.mxu1 %v134_v35 }
  0x29   :  { %121 = vmatpush.msra.mxu0 %v90_v17 }
  0x2a   :  { %160 = vmatpush.msra.mxu1 %v133_v37 }
  0x2b   :  { %122 = vmatpush.msra.mxu0 %v89_v18 }
  0x2c   :  { %161 = vmatpush.msra.mxu1 %v132_v42 }
  0x2d   :  { %123 = vmatpush.msra.mxu0 %v88_v19 }
  0x2e   :  { %162 = vmatpush.msra.mxu1 %v131_v48 }
  0x30   :  { %163 = vmatpush.msra.mxu1 %v130_v49 }
  0x32   :  { %164 = vmatpush.msra.mxu1 %v129_v50 }
  0x80   :  { %v64_v27 = vpop.permute.xlu0 %63  ;;  %v77_v36 = vpop.permute.xlu1 %76 }
  0x81   :  { %v67_v39 = vmul.f32 %v66_v32, %v64_v27  ;;  %v80_v41 = vmul.f32 %v79_v34, %v77_v36 }
  0x89   :  { %v70_v38 = vpop.permute.xlu0 %69 }
  0x8a   :  { %v73_v40 = vmul.f32 %v72_v33, %v70_v38 }
  0x8c   :  { %v74_v43 = vadd.f32 %v73_v40, %v67_v39 }
  0x8e   :  { %v81_v45 = vadd.f32 %v80_v41, %v74_v43 }
  0x90   :  { %v86_v46 = vadd.f32 %v223_v44, %v81_v45 }
  0x92   :  { %v87_v47 = vmax.f32 %v86_v46, 0.0 }
  0x94   :  { %124 = vmatmul.f32.vlgmr.msra.gmra.mxu0 %v87_v47 }
 0x111   :  { %v125_v52 = vpop.f32.mrf.mxu0 }
 0x112   :  { %v126_v53 = vadd.f32 %v224_v51, %v125_v52 }
 0x114   :  { %v128_v54 = vmax.f32 %v126_v53, 0.0 }
 0x116   :  { %165 = vmatmul.f32.vlgmr.msra.gmra.mxu1 %v128_v54 }
 0x193   :  { %v166_v56 = vpop.f32.mrf.mxu1 }
 0x194   :  { %v167_v57 = vadd.f32 %v225_v55, %v166_v56 }
 0x196   :  { %169 = vmax.xlane.f32.xlu1 %v167_v57 }
 0x209   :  { %v170_v58 = vpop.xlane.xlu1 %169 }
 0x20a   :  { %v171_v59 = vsub.f32 %v167_v57, %v170_v58 }
 0x20c   :  { %v172_v60 = vmul.f32 1.442695, %v171_v59 }
 0x20e   :  { %226 = vpow2.f32 %v172_v60 }
 0x214   :  { %v227_v61 = vpop.eup %226 }
 0x215   :  { %174 = vadd.xlane.f32.xlu2 %v227_v61 }
 0x288   :  { %v175_v62 = vpop.xlane.xlu2 %174 }
 0x289   :  { %228 = vrcp.f32 %v175_v62  ;;  %v187_v2 = vand.u32 2147483648, %v175_v62  ;;  %v185_v4 = vand.u32 2147483647, %v175_v62  ;;  %vm181_vm1 = vweird.f32 %v175_v62 }
 0x28b   :  { %v188_v6 = vor.u32 1.1754944e-38, %v187_v2  ;;  %vm186_vm3 = vcmp.eq.f32.partialorder %v185_v4, 8.507059e+37 }
 0x28f   :  { %v229_v63 = vpop.eup %228 }
 0x290   :  { %v177_v0 = vmul.f32 %v229_v63, %v175_v62  ;;  %vm182_vm0 = vweird.f32 %v229_v63 }
 0x291   :  { %vm183_vm2 = vmor %vm181_vm1, %vm182_vm0 }
 0x292   :  { %v178_v1 = vsub.f32 1.0, %v177_v0 }
 0x294   :  { %v179_v3 = vmul.f32 %v229_v63, %v178_v1 }
 0x296   :  { %v180_v5 = vadd.f32 %v229_v63, %v179_v3 }
 0x298   :  { %v184_v7 = vsel %vm183_vm2, %v229_v63, %v180_v5 }
 0x299   :  { %v189_v8 = vsel %vm186_vm3, %v188_v6, %v184_v7 }
 0x29a   :  { %v190_v9 = vmul.f32 %v227_v61, %v189_v8 }
 0x29c   :  { %192 = vst.msk [vmem:[#allocation7] sm:$0xff] %vm191_vm4, %v190_v9 }
 0x29d   :  { %203 = dma.vmem_to_hbm [thread:$0]  %s199_s6, 128, %s201_s20, [#allocation4]  }
 0x29e   :  { %306 = dma.done.wait [#allocation4], 128  }
 0x29f   :  { %307 = vsyncadd [#allocation4], 4294967168 }
 0x2a0   :  { %208 = vsyncpa [#allocation3], 1 }
 0x2a1   :  { %209 = vsyncpa [#allocation6], 1 }
 0x2a2   :  { %210 = vsyncpa [#allocation4], 1 }

</bundles_post_ra>
